<compile_context>
chip_gen: v5e
topology: v5e:2x2
jax: 0.10.0
libtpu: 0.0.40
codegen_flags: <defaults>
</compile_context>

<pallas_src>
import functools

import jax
import jax.numpy as jnp
from jax import lax
from jax.experimental import pallas as pl
from jax.experimental.pallas import tpu as pltpu

_LANE_CANDIDATES = (512, 256, 128)
_MEAN_BLOCK_BYTES = 4 * 1024 * 1024   # per input buffer (mean path)
_NONE_BLOCK_BYTES = 2 * 1024 * 1024   # per in/out buffer ('none' path)
_SUB_ELEMS = 16384                    # inner-chunk element count (vreg-resident)
_VMEM_LIMIT_BYTES = 32 * 1024 * 1024


def _sublane_packing(dtype):
    return {4: 8, 2: 16, 1: 32}.get(jnp.dtype(dtype).itemsize, 8)


def _is_integer_gamma(gamma):
    return isinstance(gamma, int) or (
        isinstance(gamma, float) and float(gamma).is_integer())


def _focal_weight_times_x(x, gamma):
    """(1 - exp(-x))**gamma * x, in the dtype of x (integer gamma stays on VPU)."""
    p = jnp.exp(-x)
    base = 1.0 - p
    if _is_integer_gamma(gamma):
        g = int(gamma)
        w = jnp.ones_like(base) if g == 0 else lax.integer_pow(base, g)
    else:
        # TODO(synk): non-integer gamma adds 2 extra EUP transcendentals/elem.
        w = base ** gamma
    return w * x


def _fold_rows_to_8(part):
    """(R, L) f32 -> (8, L) via aligned halving adds; R is a power-of-2 multiple of 8."""
    r = part.shape[0]
    while r > 8:
        h = r // 2
        part = part[:h, :] + part[h:, :]
        r = h
    return part


def _fold_lanes_to_128(part):
    """(8, L) f32 -> (8, 128) via lane-aligned halving adds; L in {128, 256, 512}."""
    l = part.shape[1]
    while l > 128:
        h = l // 2
        part = part[:, :h] + part[:, h:]
        l = h
    return part


def _focal_mean_kernel(x_ref, psum_ref, *, gamma, sub_rows, num_blocks,
                       valid_rows_last, compute_dtype):
    block_rows, lanes = x_ref.shape

    def accumulate(n_valid):
        # n_valid, sub_rows are Python ints -> static trip count & static mask need.
        nsub = (n_valid + sub_rows - 1) // sub_rows
        need_mask = (n_valid % sub_rows) != 0
        row_iota = (lax.broadcasted_iota(jnp.int32, (sub_rows, lanes), 0)
                    if need_mask else None)

        def body(s, acc):
            r0 = pl.multiple_of(s * sub_rows, sub_rows)
            xs = x_ref[pl.ds(r0, sub_rows), :].astype(compute_dtype)
            fl = _focal_weight_times_x(xs, gamma).astype(jnp.float32)
            if need_mask:
                row_id = row_iota + s * sub_rows
                fl = jnp.where(row_id < n_valid, fl, 0.0)
            return acc + fl

        acc = lax.fori_loop(0, nsub, body,
                            jnp.zeros((sub_rows, lanes), jnp.float32))
        psum_ref[0] = _fold_lanes_to_128(_fold_rows_to_8(acc))

    if num_blocks == 1 or valid_rows_last == block_rows:
        accumulate(block_rows)
    else:
        i = pl.program_id(0)
        last = num_blocks - 1

        @pl.when(i == last)
        def _():
            accumulate(valid_rows_last)

        @pl.when(i != last)
        def _():
            accumulate(block_rows)


def _focal_none_kernel(x_ref, o_ref, *, gamma, sub_rows, compute_dtype):
    block_rows, lanes = x_ref.shape
    nsub = block_rows // sub_rows

    def body(s, carry):
        r0 = pl.multiple_of(s * sub_rows, sub_rows)
        xs = x_ref[pl.ds(r0, sub_rows), :].astype(compute_dtype)
        fl = _focal_weight_times_x(xs, gamma)
        o_ref[pl.ds(r0, sub_rows), :] = fl.astype(o_ref.dtype)
        return carry

    lax.fori_loop(0, nsub, body, 0)


def _plan_slab(n, dtype):
    """Pick a lane-dense (rows, lanes) view; zero-copy whenever possible."""
    packing = _sublane_packing(dtype)
    for lanes in _LANE_CANDIDATES:
        if n % (lanes * packing) == 0:
            return lanes, n // lanes, n, packing
    # TODO(synk): ragged element counts (n not a multiple of 128*packing) still
    # pay one pad copy; all other shapes take the zero-copy reshape path.
    lanes = 128
    rows = ((n + lanes * packing - 1) // (lanes * packing)) * packing
    return lanes, rows, rows * lanes, packing


def _plan_blocks(rows, lanes, packing, itemsize, target_bytes):
    """Block/chunk sizes: block_rows | rows handled via partial edge blocks."""
    sub_rows = max(packing, _SUB_ELEMS // lanes)          # 8/16/32/64/128
    target_rows = max(sub_rows,
                      (target_bytes // (lanes * itemsize)) // sub_rows * sub_rows)
    if rows <= target_rows:
        block_rows = rows                                  # single full-extent block
        if block_rows % sub_rows != 0:
            sub_rows = packing                             # packing always divides rows
    else:
        block_rows = target_rows
    num_blocks = (rows + block_rows - 1) // block_rows
    valid_rows_last = rows - (num_blocks - 1) * block_rows
    return block_rows, sub_rows, num_blocks, valid_rows_last


def focal_loss(loss, reduction="mean", gamma=2):
    """JAX/Pallas equivalent of FocalLoss.forward. Returns {'loss': ...}."""
    orig_shape = loss.shape
    orig_dtype = loss.dtype
    n = loss.size

    if n == 0:
        if reduction == "mean":
            return {"loss": jnp.full((), jnp.nan, dtype=orig_dtype)}
        return {"loss": jnp.reshape(loss, orig_shape)}

    lanes, rows, padded, packing = _plan_slab(n, orig_dtype)
    itemsize = jnp.dtype(orig_dtype).itemsize
    flat = jnp.ravel(loss)                                  # layout-preserving
    if padded != n:
        flat = jnp.pad(flat, (0, padded - n))               # rare fallback only
    slab = flat.reshape(rows, lanes)

    compute_dtype = jnp.bfloat16 if orig_dtype == jnp.bfloat16 else jnp.float32

    if reduction == "mean":
        block_rows, sub_rows, num_blocks, valid_last = _plan_blocks(
            rows, lanes, packing, itemsize, _MEAN_BLOCK_BYTES)
        kernel = functools.partial(
            _focal_mean_kernel, gamma=gamma, sub_rows=sub_rows,
            num_blocks=num_blocks, valid_rows_last=valid_last,
            compute_dtype=compute_dtype)
        psums = pl.pallas_call(
            kernel,
            out_shape=jax.ShapeDtypeStruct((num_blocks, 8, 128), jnp.float32),
            grid_spec=pltpu.PrefetchScalarGridSpec(
                num_scalar_prefetch=0,
                grid=(num_blocks,),
                in_specs=[pl.BlockSpec((block_rows, lanes), lambda i: (i, 0))],
                out_specs=pl.BlockSpec((1, 8, 128), lambda i: (i, 0, 0)),
            ),
            compiler_params=pltpu.CompilerParams(
                dimension_semantics=("parallel",),
                vmem_limit_bytes=_VMEM_LIMIT_BYTES,
            ),
        )(slab)
        # Padded / masked elements contribute exactly 0; divide by the true n.
        mean = jnp.sum(psums) / jnp.float32(n)
        return {"loss": mean.astype(orig_dtype)}

    # reduction != 'mean' -> elementwise focal weighting, original shape/dtype.
    block_rows, sub_rows, num_blocks, _ = _plan_blocks(
        rows, lanes, packing, itemsize, _NONE_BLOCK_BYTES)
    kernel = functools.partial(
        _focal_none_kernel, gamma=gamma, sub_rows=sub_rows,
        compute_dtype=compute_dtype)
    out = pl.pallas_call(
        kernel,
        out_shape=jax.ShapeDtypeStruct((rows, lanes), orig_dtype),
        grid_spec=pltpu.PrefetchScalarGridSpec(
            num_scalar_prefetch=0,
            grid=(num_blocks,),
            in_specs=[pl.BlockSpec((block_rows, lanes), lambda i: (i, 0))],
            out_specs=pl.BlockSpec((block_rows, lanes), lambda i: (i, 0)),
        ),
        compiler_params=pltpu.CompilerParams(
            dimension_semantics=("parallel",),
            vmem_limit_bytes=_VMEM_LIMIT_BYTES,
        ),
    )(slab)
    out_flat = out.reshape(-1)
    if padded != n:
        out_flat = out_flat[:n]
    return {"loss": out_flat.reshape(orig_shape)}


if __name__ == "__main__":
    def reference(x, gamma=2):
        p = jnp.exp(-x)
        return (1.0 - p) ** gamma * x

    k0, k1, k2 = jax.random.split(jax.random.PRNGKey(0), 3)

    # Primary case: NCHW-like per-element loss map (zero-copy slab path).
    x = jax.random.uniform(k0, (2, 4, 16, 16), dtype=jnp.float32,
                           minval=0.0, maxval=3.0)
    ref_elem = reference(x)
    ref_mean = jnp.mean(ref_elem)

    out_mean = jax.block_until_ready(focal_loss(x, reduction="mean", gamma=2)["loss"])
    assert jnp.allclose(out_mean, ref_mean, rtol=1e-5, atol=1e-6), (out_mean, ref_mean)

    out_none = jax.block_until_ready(focal_loss(x, reduction="none", gamma=2)["loss"])
    assert out_none.shape == x.shape and out_none.dtype == x.dtype
    assert jnp.allclose(out_none, ref_elem, rtol=1e-5, atol=1e-6)

    # Ragged element count (exercises the padded fallback path).
    x_r = jax.random.uniform(k1, (3, 5, 7), dtype=jnp.float32,
                             minval=0.0, maxval=3.0)
    ref_r = reference(x_r)
    out_r_mean = jax.block_until_ready(focal_loss(x_r, reduction="mean")["loss"])
    assert jnp.allclose(out_r_mean, jnp.mean(ref_r), rtol=1e-5, atol=1e-6)
    out_r_none = jax.block_until_ready(focal_loss(x_r, reduction="none")["loss"])
    assert out_r_none.shape == x_r.shape
    assert jnp.allclose(out_r_none, ref_r, rtol=1e-5, atol=1e-6)

    # Multi-block case with a partial (masked) edge block.
    x_b = jax.random.uniform(k2, (2, 1028, 512), dtype=jnp.float32,
                             minval=0.0, maxval=3.0)
    ref_b = reference(x_b)
    out_b_mean = jax.block_until_ready(focal_loss(x_b, reduction="mean")["loss"])
    assert jnp.allclose(out_b_mean, jnp.mean(ref_b), rtol=1e-4, atol=1e-6)
    out_b_none = jax.block_until_ready(focal_loss(x_b, reduction="none")["loss"])
    assert jnp.allclose(out_b_none, ref_b, rtol=1e-5, atol=1e-6)

    print("KERNEL_OK")
</pallas_src>

<mosaic_0001>
module attributes {stable_mosaic.version = 11 : i64} {
  func.func @_focal_mean_kernel(%arg0: i32, %arg1: memref<8x256xf32, #tpu.memory_space<vmem>>, %arg2: memref<1x8x128xf32, #tpu.memory_space<vmem>>) attributes {dimension_semantics = [#tpu.dimension_semantics<parallel>], iteration_bounds = array<i64: 1>, scalar_prefetch = 0 : i64, scratch_operands = 0 : i64, tpu.core_type = #tpu.core_type<tc>, window_params = [{transform_indices = @transform_0, window_bounds = array<i64: 8, 256>}, {transform_indices = @transform_1, window_bounds = array<i64: 1, 8, 128>}]} {
    %cst = arith.constant 0.000000e+00 : f32
    %0 = vector.broadcast %cst : f32 to vector<8x256xf32>
    %c0_i32 = arith.constant 0 : i32
    %c8_i32 = arith.constant 8 : i32
    %1 = arith.muli %c0_i32, %c8_i32 : i32
    %2 = tpu.assume_multiple %1, 8 : i32
    %3 = arith.index_cast %2 : i32 to index
    %c0 = arith.constant 0 : index
    %4 = vector.load %arg1[%3, %c0] : memref<8x256xf32, #tpu.memory_space<vmem>>, vector<8x256xf32>
    %cst_0 = arith.constant 0.000000e+00 : f32
    %5 = vector.broadcast %cst_0 : f32 to vector<8x256xf32>
    %6 = arith.subf %5, %4 : vector<8x256xf32>
    %7 = math.exp %6 : vector<8x256xf32>
    %cst_1 = arith.constant 1.000000e+00 : f32
    %8 = vector.broadcast %cst_1 : f32 to vector<8x256xf32>
    %9 = arith.subf %8, %7 : vector<8x256xf32>
    %10 = arith.mulf %9, %9 : vector<8x256xf32>
    %11 = arith.mulf %10, %4 : vector<8x256xf32>
    %12 = arith.addf %0, %11 : vector<8x256xf32>
    %c1_i32 = arith.constant 1 : i32
    %13 = vector.extract_strided_slice %12 {offsets = [0, 0], sizes = [8, 128], strides = [1, 1]} : vector<8x256xf32> to vector<8x128xf32>
    %14 = vector.extract_strided_slice %12 {offsets = [0, 128], sizes = [8, 128], strides = [1, 1]} : vector<8x256xf32> to vector<8x128xf32>
    %15 = arith.addf %13, %14 : vector<8x128xf32>
    %c0_2 = arith.constant 0 : index
    %c0_3 = arith.constant 0 : index
    %c0_4 = arith.constant 0 : index
    %16 = vector.load %arg2[%c0_2, %c0_3, %c0_4] : memref<1x8x128xf32, #tpu.memory_space<vmem>>, vector<1x8x128xf32>
    %17 = vector.shape_cast %16 : vector<1x8x128xf32> to vector<8x128xf32>
    %18 = vector.shape_cast %15 : vector<8x128xf32> to vector<1x8x128xf32>
    tpu.vector_store %arg2[%c0_2, %c0_3, %c0_4], %18 {strides = array<i32>} : memref<1x8x128xf32, #tpu.memory_space<vmem>>, vector<1x8x128xf32>,
    return
  }
  func.func @transform_0(%arg0: i32) -> (i32, i32) {
    %c0_i32 = arith.constant 0 : i32
    %c0_i32_0 = arith.constant 0 : i32
    return %arg0, %c0_i32 : i32, i32
  }
  func.func @transform_1(%arg0: i32) -> (i32, i32, i32) {
    %c0_i32 = arith.constant 0 : i32
    %c0_i32_0 = arith.constant 0 : i32
    %c0_i32_1 = arith.constant 0 : i32
    return %arg0, %c0_i32, %c0_i32_0 : i32, i32, i32
  }
}

</mosaic_0001>

<bundles_post_ra>
// kernel: tpu_custom_call.1
= control target key start
LH: loop header
LB: loop body
LE: loop exit
PB: predicated region body
PF: predicated region fallthrough
CT: control target
= control target key end

     0   :  { %6 = vsyncpa [#allocation3], 0  ;;  %s137_s0 = inlined_call_operand.hbm [shape: f32[8,256], index: 0, kind: input, shape index: {}]   ;;  %s138_s1 = inlined_call_operand.hbm [shape: f32[1,8,128], index: 1, kind: output, shape index: {}]  }
   0x1   :  { %7 = vsyncpa [#allocation4], 0  ;;  %s13_s8 = sshll.u32 %s137_s0, 4  ;;  %s119_s9 = smov [#allocation2]   ;;  %s14_s8 = int_to_ptr.hbm [resolvable:$true] %s13_s8 }
   0x2   :  { %s15_s10 = sshll.u32 %s119_s9, 4  ;;  %s16_s10 = int_to_ptr.vmem [resolvable:$true] %s15_s10 }
   0x3   :  { %18 = dma.hbm_to_vmem [thread:$0]  %s14_s8, 256, %s16_s10, [#allocation3]  }
   0x4   :  { %115 = dma.done.wait [#allocation3], 256  }
   0x5   :  { %116 = vsyncadd [#allocation3], 4294967040  ;;  %v26_v0 = vld [vmem:[#allocation2] sm:$0xff]  ;;  %v27_v1 = vld [vmem:[#allocation2 + $0x8] sm:$0xff]  ;;  %s120_s0 = smov [#allocation5]   ;;  %s51_s14 = sshll.u32 %s138_s1, 4  ;;  %s52_s14 = int_to_ptr.hbm [resolvable:$true] %s51_s14 }
   0x6   :  { %v28_v2 = vsub.f32 0.0, %v26_v0  ;;  %v29_v3 = vsub.f32 0.0, %v27_v1  ;;  %s49_s11 = sshll.u32 %s120_s0, 4  ;;  %s50_s11 = int_to_ptr.vmem [resolvable:$true] %s49_s11 }
   0x8   :  { %v30_v4 = vmul.f32 1.442695, %v28_v2  ;;  %v32_v5 = vmul.f32 1.442695, %v29_v3 }
   0xa   :  { %63 = vpow2.f32 %v30_v4 }
   0xb   :  { %65 = vpow2.f32 %v32_v5 }
  0x10   :  { %v64_v6 = vpop.eup %63 }
  0x11   :  { %v66_v7 = vpop.eup %65  ;;  %v34_v8 = vsub.f32 1.0, %v64_v6 }
  0x12   :  { %v35_v9 = vsub.f32 1.0, %v66_v7 }
  0x13   :  { %v36_v10 = vmul.f32 %v34_v8, %v34_v8 }
  0x14   :  { %v37_v11 = vmul.f32 %v35_v9, %v35_v9 }
  0x15   :  { %v38_v12 = vmul.f32 %v36_v10, %v26_v0 }
  0x16   :  { %v39_v13 = vmul.f32 %v37_v11, %v27_v1 }
  0x18   :  { %v42_v14 = vadd.f32 %v39_v13, %v38_v12 }
  0x1a   :  { %43 = vst [vmem:[#allocation5] sm:$0xff] %v42_v14 }
  0x1b   :  { %54 = dma.vmem_to_hbm [thread:$0]  %s50_s11, 128, %s52_s14, [#allocation4]  }
  0x1c   :  { %117 = dma.done.wait [#allocation4], 128  }
  0x1d   :  { %118 = vsyncadd [#allocation4], 4294967168 }
  0x1e   :  { %59 = vsyncpa [#allocation3], 1 }
  0x1f   :  { %60 = vsyncpa [#allocation4], 1 }

</bundles_post_ra>
